<compile_context>
chip_gen: v7x
topology: tpu7x:2x2x1
jax: 0.10.0
libtpu: 0.0.40
codegen_flags: <defaults>
</compile_context>

<pallas_src>
import jax
import jax.numpy as jnp
from jax.experimental import pallas as pl
from jax.experimental.pallas import tpu as pltpu


def _patchify_fused_kernel(x_ref, w_ref, b_ref, o_ref):
    # x_ref: (C*P, tT)   fused-patch input tile, T lane-dense
    # w_ref: (O, C*P)    fused weights (expand x patch)
    # b_ref: (O, 1)      fused bias (f32)
    # o_ref: (O, tT)     output tile
    acc = jnp.dot(w_ref[...], x_ref[...], preferred_element_type=jnp.float32)
    o_ref[...] = (acc + b_ref[...]).astype(o_ref.dtype)


def _round_up(x, m):
    return ((x + m - 1) // m) * m


def _vmem_capacity_bytes():
    """Physical VMEM of the current TPU generation; conservative fallback."""
    try:
        return int(pltpu.get_tpu_info().vmem_capacity_bytes)
    except Exception:
        return 64 << 20  # safe for v7x (64 MiB/TC); v5e/v6e have 128 MiB


def _choose_tile_T(T, N, CP, O, in_item, out_item, vmem_cap):
    """Largest lane-dense T tile whose double-buffered tiles + weights fit VMEM."""
    budget = max(int(vmem_cap * 0.72), 8 << 20)
    CP_p = _round_up(CP, 8)
    O_p = _round_up(O, 8)
    # Weights/bias counted double-buffered so the plan stays valid even if the
    # single-buffered (Buffered(1)) spec is unavailable on this jax version.
    w_bytes = 2 * O_p * _round_up(CP, 128) * in_item + 2 * O_p * 128 * 4

    def fits(t):
        lanes = max(_round_up(t, 128), 128)
        x_tile = CP_p * lanes * in_item
        o_tile = O_p * lanes * out_item
        return 2 * (x_tile + o_tile) + w_bytes + (2 << 20) <= budget

    if T <= 128:
        return T

    tT = None
    for cand in (2048, 1024, 512, 256, 128):
        if cand <= T and fits(cand):
            tT = cand
            break
    if tT is None:
        # Very large C*P*O: fall back to the smallest lane-dense tile.
        # (A further step would be a third "arbitrary" grid axis over CP with an
        #  f32 accumulator scratch, the standard reduction-tiling pattern.)
        tT = 128

    # Keep enough independent grid steps to feed both v7x TensorCores.
    while tT > 128 and N * pl.cdiv(T, tT) < 4:
        tT //= 2
    return tT


def patchify_block(x, w_patch, b_patch, w_expand, b_expand, patch_size,
                   *, compute_dtype=jnp.bfloat16, out_dtype=None):
    """x: (N, C, L) (NCL, same as PyTorch Conv1d input).

    w_patch : (C, 1, P)  depthwise conv weight
    b_patch : (C,)       depthwise conv bias
    w_expand: (O, C, 1)  1x1 conv weight
    b_expand: (O,)       1x1 conv bias
    returns : (N, O, L // P), dtype = out_dtype (default: x.dtype)

    compute_dtype=jnp.float32 gives an exact match to the f32 PyTorch convs at
    the cost of 2x MXU/HBM traffic on the input side.
    """
    N, C, L = x.shape
    P = patch_size
    T = L // P
    O = w_expand.shape[0]
    CP = C * P
    out_dtype = x.dtype if out_dtype is None else out_dtype

    # Glue: (N, C, L) -> (N, C, T, P) -> (N, C, P, T) -> (N, C*P, T), cast to the
    # MXU input dtype in the same fused XLA pass.  Trailing remainder of L is
    # dropped, matching stride-P conv semantics.  T lands on the 128-lane axis.
    x_r = (x[:, :, : T * P]
           .reshape(N, C, T, P)
           .transpose(0, 1, 3, 2)
           .reshape(N, CP, T)
           .astype(compute_dtype))

    # Fuse the two convs: W_fused[o, c*P+p] = w_expand[o,c] * w_patch[c,p]
    #                     b_fused[o]        = w_expand[o,:] @ b_patch + b_expand[o]
    w1 = w_patch.reshape(C, P).astype(jnp.float32)
    w2 = w_expand.reshape(O, C).astype(jnp.float32)
    w_fused = (w2[:, :, None] * w1[None, :, :]).reshape(O, CP).astype(compute_dtype)
    b_fused = (w2 @ b_patch.astype(jnp.float32)
               + b_expand.astype(jnp.float32)).reshape(O, 1).astype(jnp.float32)

    in_item = jnp.dtype(compute_dtype).itemsize
    out_item = jnp.dtype(out_dtype).itemsize
    vmem_cap = _vmem_capacity_bytes()
    tT = _choose_tile_T(T, N, CP, O, in_item, out_item, vmem_cap)
    grid = (N, pl.cdiv(T, tT))

    # VMEM limit derived from what the chosen tiles actually need, capped by the
    # physical capacity of this generation (no fixed 56 MiB clamp).
    lanes = max(_round_up(tT, 128), 128)
    x_tile = _round_up(CP, 8) * lanes * in_item
    o_tile = _round_up(O, 8) * lanes * out_item
    w_bytes = 2 * _round_up(O, 8) * _round_up(CP, 128) * in_item + 2 * _round_up(O, 8) * 128 * 4
    need = 2 * (x_tile + o_tile) + w_bytes + (4 << 20)
    vmem_bytes = int(min(max(need, 16 << 20), int(vmem_cap * 0.95)))

    cost = pl.CostEstimate(
        flops=2 * N * O * CP * T,
        transcendentals=0,
        bytes_accessed=(N * CP * T * in_item          # x tiles
                        + O * CP * in_item + O * 4    # weights + bias
                        + N * O * T * out_item),      # output
    )

    def _build_and_run(single_buffer_weights):
        wkw = dict(pipeline_mode=pl.Buffered(1)) if single_buffer_weights else {}
        in_specs = [
            # Squeeze the size-1 batch dim so the kernel sees 2-D (C*P, tT).
            pl.BlockSpec((None, CP, tT), lambda n, t: (n, 0, t)),
            pl.BlockSpec((O, CP), lambda n, t: (0, 0), **wkw),
            pl.BlockSpec((O, 1), lambda n, t: (0, 0), **wkw),
        ]
        return pl.pallas_call(
            _patchify_fused_kernel,
            out_shape=jax.ShapeDtypeStruct((N, O, T), out_dtype),
            grid_spec=pltpu.PrefetchScalarGridSpec(
                num_scalar_prefetch=0,
                grid=grid,
                in_specs=in_specs,
                out_specs=pl.BlockSpec((None, O, tT), lambda n, t: (n, 0, t)),
            ),
            compiler_params=pltpu.CompilerParams(
                # Both axes independent -> shard across TensorCores on v7x;
                # harmless on single-TC v5e/v6e.
                dimension_semantics=("parallel", "parallel"),
                vmem_limit_bytes=vmem_bytes,
            ),
            cost_estimate=cost,
        )(x_r, w_fused, b_fused)

    try:
        return _build_and_run(True)
    except Exception:
        # This jax version does not accept single-buffered (Buffered(1)) specs;
        # retry with default double-buffered weights (already in the VMEM budget).
        return _build_and_run(False)


def _reference(x, w_patch, b_patch, w_expand, b_expand, patch_size):
    # Pure-JAX f32 reference of the same math for a correctness check.
    N, C, L = x.shape
    P = patch_size
    T = L // P
    O = w_expand.shape[0]
    x_r = x[:, :, : T * P].reshape(N, C, T, P)
    w1 = w_patch.reshape(C, P)
    h = jnp.einsum("nctp,cp->nct", x_r, w1) + b_patch[None, :, None]          # (N, C, T)
    out = jnp.einsum("oc,nct->not", w_expand.reshape(O, C), h) + b_expand[None, :, None]
    return out


if __name__ == "__main__":
    # Small, deterministic synthetic config (LazyConv1d infers in_channels == input_channel,
    # so the "patch" conv is depthwise).
    patch_size = 4
    input_channel = 4     # C
    output_channel = 8    # O
    batch = 2             # N
    length = 16           # L  (divisible by patch_size)

    key = jax.random.PRNGKey(0)
    k_x, k_w1, k_b1, k_w2, k_b2 = jax.random.split(key, 5)

    x = jax.random.normal(k_x, (batch, input_channel, length), dtype=jnp.float32)
    w_patch = jax.random.normal(k_w1, (input_channel, 1, patch_size), dtype=jnp.float32) * 0.1
    b_patch = jax.random.normal(k_b1, (input_channel,), dtype=jnp.float32) * 0.1
    w_expand = jax.random.normal(k_w2, (output_channel, input_channel, 1), dtype=jnp.float32) * 0.1
    b_expand = jax.random.normal(k_b2, (output_channel,), dtype=jnp.float32) * 0.1

    out = patchify_block(x, w_patch, b_patch, w_expand, b_expand, patch_size)
    out = jax.block_until_ready(out)

    ref = _reference(x, w_patch, b_patch, w_expand, b_expand, patch_size)
    assert out.shape == (batch, output_channel, length // patch_size)
    # bf16 MXU inputs with f32 accumulation -> loose-but-tight-enough tolerance.
    assert jnp.allclose(out, ref, atol=2e-2, rtol=2e-2)

    print("KERNEL_OK")
</pallas_src>

<mosaic_0001>
module attributes {stable_mosaic.version = 11 : i64} {
  func.func @_patchify_fused_kernel(%arg0: i32, %arg1: i32, %arg2: memref<1x16x4xbf16, #tpu.memory_space<vmem>>, %arg3: memref<8x16xbf16, #tpu.memory_space<vmem>>, %arg4: memref<8x1xf32, #tpu.memory_space<vmem>>, %arg5: memref<1x8x4xf32, #tpu.memory_space<vmem>>) attributes {dimension_semantics = [#tpu.dimension_semantics<parallel>, #tpu.dimension_semantics<parallel>], iteration_bounds = array<i64: 2, 1>, scalar_prefetch = 0 : i64, scratch_operands = 0 : i64, tpu.core_type = #tpu.core_type<tc>, window_params = [{transform_indices = @transform_0, window_bounds = array<i64: 1, 16, 4>}, {pipeline_mode = #tpu.pipeline_mode<synchronous>, transform_indices = @transform_1, window_bounds = array<i64: 8, 16>}, {pipeline_mode = #tpu.pipeline_mode<synchronous>, transform_indices = @transform_2, window_bounds = array<i64: 8, 1>}, {transform_indices = @transform_3, window_bounds = array<i64: 1, 8, 4>}]} {
    %c0 = arith.constant 0 : index
    %c0_0 = arith.constant 0 : index
    %0 = vector.load %arg3[%c0, %c0_0] : memref<8x16xbf16, #tpu.memory_space<vmem>>, vector<8x16xbf16>
    %c0_1 = arith.constant 0 : index
    %c0_2 = arith.constant 0 : index
    %c0_3 = arith.constant 0 : index
    %1 = vector.load %arg2[%c0_1, %c0_2, %c0_3] : memref<1x16x4xbf16, #tpu.memory_space<vmem>>, vector<1x16x4xbf16>
    %2 = vector.shape_cast %1 : vector<1x16x4xbf16> to vector<16x4xbf16>
    %cst = arith.constant dense<0.000000e+00> : vector<8x4xf32>
    %3 = tpu.matmul %0, %2, %cst {dimension_numbers = #tpu.dot_dimension_numbers<[1], [0], [0], [1], [0, 0, 1, 1], [], []>} : vector<8x16xbf16>, vector<16x4xbf16>, vector<8x4xf32> -> vector<8x4xf32>
    %c0_4 = arith.constant 0 : index
    %c0_5 = arith.constant 0 : index
    %4 = vector.load %arg4[%c0_4, %c0_5] : memref<8x1xf32, #tpu.memory_space<vmem>>, vector<8x1xf32>
    %5 = vector.broadcast %4 : vector<8x1xf32> to vector<8x4xf32>
    %6 = arith.addf %3, %5 : vector<8x4xf32>
    %c0_6 = arith.constant 0 : index
    %c0_7 = arith.constant 0 : index
    %c0_8 = arith.constant 0 : index
    %7 = vector.load %arg5[%c0_6, %c0_7, %c0_8] : memref<1x8x4xf32, #tpu.memory_space<vmem>>, vector<1x8x4xf32>
    %8 = vector.shape_cast %7 : vector<1x8x4xf32> to vector<8x4xf32>
    %9 = vector.shape_cast %6 : vector<8x4xf32> to vector<1x8x4xf32>
    tpu.vector_store %arg5[%c0_6, %c0_7, %c0_8], %9 {strides = array<i32>} : memref<1x8x4xf32, #tpu.memory_space<vmem>>, vector<1x8x4xf32>,
    return
  }
  func.func @transform_0(%arg0: i32, %arg1: i32) -> (i32, i32, i32) {
    %c0_i32 = arith.constant 0 : i32
    %c0_i32_0 = arith.constant 0 : i32
    return %arg0, %c0_i32, %arg1 : i32, i32, i32
  }
  func.func @transform_1(%arg0: i32, %arg1: i32) -> (i32, i32) {
    %c0_i32 = arith.constant 0 : i32
    %c0_i32_0 = arith.constant 0 : i32
    %c0_i32_1 = arith.constant 0 : i32
    return %c0_i32, %c0_i32_0 : i32, i32
  }
  func.func @transform_2(%arg0: i32, %arg1: i32) -> (i32, i32) {
    %c0_i32 = arith.constant 0 : i32
    %c0_i32_0 = arith.constant 0 : i32
    %c0_i32_1 = arith.constant 0 : i32
    return %c0_i32, %c0_i32_0 : i32, i32
  }
  func.func @transform_3(%arg0: i32, %arg1: i32) -> (i32, i32, i32) {
    %c0_i32 = arith.constant 0 : i32
    %c0_i32_0 = arith.constant 0 : i32
    return %arg0, %c0_i32, %arg1 : i32, i32, i32
  }
}

module attributes {stable_mosaic.version = 11 : i64} {
  func.func @_patchify_fused_kernel(%arg0: i32, %arg1: i32, %arg2: memref<1x16x4xbf16, #tpu.memory_space<vmem>>, %arg3: memref<8x16xbf16, #tpu.memory_space<vmem>>, %arg4: memref<8x1xf32, #tpu.memory_space<vmem>>, %arg5: memref<1x8x4xf32, #tpu.memory_space<vmem>>) attributes {dimension_semantics = [#tpu.dimension_semantics<parallel>, #tpu.dimension_semantics<parallel>], iteration_bounds = array<i64: 2, 1>, scalar_prefetch = 0 : i64, scratch_operands = 0 : i64, tpu.core_type = #tpu.core_type<tc>, window_params = [{transform_indices = @transform_0, window_bounds = array<i64: 1, 16, 4>}, {pipeline_mode = #tpu.pipeline_mode<synchronous>, transform_indices = @transform_1, window_bounds = array<i64: 8, 16>}, {pipeline_mode = #tpu.pipeline_mode<synchronous>, transform_indices = @transform_2, window_bounds = array<i64: 8, 1>}, {transform_indices = @transform_3, window_bounds = array<i64: 1, 8, 4>}]} {
    %c0 = arith.constant 0 : index
    %c0_0 = arith.constant 0 : index
    %0 = vector.load %arg3[%c0, %c0_0] : memref<8x16xbf16, #tpu.memory_space<vmem>>, vector<8x16xbf16>
    %c0_1 = arith.constant 0 : index
    %c0_2 = arith.constant 0 : index
    %c0_3 = arith.constant 0 : index
    %1 = vector.load %arg2[%c0_1, %c0_2, %c0_3] : memref<1x16x4xbf16, #tpu.memory_space<vmem>>, vector<1x16x4xbf16>
    %2 = vector.shape_cast %1 : vector<1x16x4xbf16> to vector<16x4xbf16>
    %cst = arith.constant dense<0.000000e+00> : vector<8x4xf32>
    %3 = tpu.matmul %0, %2, %cst {dimension_numbers = #tpu.dot_dimension_numbers<[1], [0], [0], [1], [0, 0, 1, 1], [], []>} : vector<8x16xbf16>, vector<16x4xbf16>, vector<8x4xf32> -> vector<8x4xf32>
    %c0_4 = arith.constant 0 : index
    %c0_5 = arith.constant 0 : index
    %4 = vector.load %arg4[%c0_4, %c0_5] : memref<8x1xf32, #tpu.memory_space<vmem>>, vector<8x1xf32>
    %5 = vector.broadcast %4 : vector<8x1xf32> to vector<8x4xf32>
    %6 = arith.addf %3, %5 : vector<8x4xf32>
    %c0_6 = arith.constant 0 : index
    %c0_7 = arith.constant 0 : index
    %c0_8 = arith.constant 0 : index
    %7 = vector.load %arg5[%c0_6, %c0_7, %c0_8] : memref<1x8x4xf32, #tpu.memory_space<vmem>>, vector<1x8x4xf32>
    %8 = vector.shape_cast %7 : vector<1x8x4xf32> to vector<8x4xf32>
    %9 = vector.shape_cast %6 : vector<8x4xf32> to vector<1x8x4xf32>
    tpu.vector_store %arg5[%c0_6, %c0_7, %c0_8], %9 {strides = array<i32>} : memref<1x8x4xf32, #tpu.memory_space<vmem>>, vector<1x8x4xf32>,
    return
  }
  func.func @transform_0(%arg0: i32, %arg1: i32) -> (i32, i32, i32) {
    %c0_i32 = arith.constant 0 : i32
    %c0_i32_0 = arith.constant 0 : i32
    return %arg0, %c0_i32, %arg1 : i32, i32, i32
  }
  func.func @transform_1(%arg0: i32, %arg1: i32) -> (i32, i32) {
    %c0_i32 = arith.constant 0 : i32
    %c0_i32_0 = arith.constant 0 : i32
    %c0_i32_1 = arith.constant 0 : i32
    return %c0_i32, %c0_i32_0 : i32, i32
  }
  func.func @transform_2(%arg0: i32, %arg1: i32) -> (i32, i32) {
    %c0_i32 = arith.constant 0 : i32
    %c0_i32_0 = arith.constant 0 : i32
    %c0_i32_1 = arith.constant 0 : i32
    return %c0_i32, %c0_i32_0 : i32, i32
  }
  func.func @transform_3(%arg0: i32, %arg1: i32) -> (i32, i32, i32) {
    %c0_i32 = arith.constant 0 : i32
    %c0_i32_0 = arith.constant 0 : i32
    return %arg0, %c0_i32, %arg1 : i32, i32, i32
  }
}

</mosaic_0001>

<bundles_post_ra>
// kernel: tpu_custom_call.1
= control target key start
LH: loop header
LB: loop body
LE: loop exit
PB: predicated region body
PF: predicated region fallthrough
CT: control target
= control target key end

     0   :  { %s436_s12 = smov 0   ;;  %s438_s13 = smov 0   ;;  %s475_s0 = inlined_call_operand.vmem [shape: bf16[2,16,4], index: 0, kind: input, shape index: {}]   ;;  %s476_s1 = inlined_call_operand.vmem [shape: bf16[8,16], index: 1, kind: input, shape index: {}]   ;;  %s477_s2 = inlined_call_operand.vmem [shape: f32[8,1], index: 2, kind: input, shape index: {}]   ;;  %s478_s3 = inlined_call_operand.vmem [shape: f32[2,8,4], index: 3, kind: output, shape index: {}]  }
   0x1   :  { %s440_s14 = smov 0  }
   0x2 LB: > { %s25_s15 = sadd.s32 1, %s407_s13  ;;  %p343_p0 = scmp.ge.s32.totalorder %s411_s14, 1  ;;  %s411_s14 = sphi %s440_s14, %s13_s14   ;;  %s407_s13 = sphi %s438_s13, %s480_s13   ;;  %s403_s12 = sphi %s436_s12, %s479_s12  }
   0x3   : > { %p27_p1 = scmp.ge.s32.totalorder %s25_s15, 2  ;;  %p156_p2 = scmp.lt.s32.totalorder %s411_s14, 3 }
   0x5   : > { %s482_s15 = smov (%p27_p1, %s25_s15), 0  ;;  %p157_p3 = pnand %p343_p0, %p156_p2 }
   0x6   : > { %p185_p4 = scmp.lt.s32.totalorder (!%p157_p3), %s403_s12, 1  ;;  %v413_v0 = vmov (!%p157_p3), 0.0   ;;  %vm414_vm0 = vmmov (!%p157_p3), 0   ;;  %v204_v1 = vld [vmem:[%s477_s2] sm:$0xff] (!%p157_p3)  ;;  %v415_v2 = vmov (!%p157_p3), 0   ;;  %vm216_vm1 = vcmask (!%p157_p3), 130048  }
   0x7   : > { %160 = sbr.rel (%p157_p3) target bundleno = 236 (0xec), region = 32  ;;  %354 = vmatprep.subr.bf16.mxu0 (!%p157_p3), %v413_v0  ;;  %356 = vmatprep.mubr.msk.bf16.mxu0 (!%p157_p3), %vm414_vm0, %v413_v0  ;;  %v201_v4 = vld [vmem:[%s476_s1] sm:$0xf] (!%p157_p3)  ;;  %vm260_vm2 = vcmask (!%p157_p3), 31744  }
   0x8   : > { %387 = vset.pattern.permute.xlu0 (!%p157_p3), %v415_v2 }
   0x9   : > { %207 = vperm.xlu0 (!%p157_p3), %387, %v204_v1  }
   0xe   : > { %s484_s12 = smov (!%p185_p4, %s403_s12), 1 }
   0xf   : > { %s351_s18 = sshll.u32 %s484_s12, 3 }
  0x10   : > { %s192_s21 = scalar_lea.vmem %s475_s0, %s351_s18  ;;  %s199_s26 = scalar_lea.vmem %s478_s3, %s351_s18 }
  0x11   : > { %v388_v3 = vld [vmem:[%s192_s21] sm:$0xff]  }
  0x12   : > { %355 = vmatpush3.bf16.msra.mxu0 %v388_v3 }
  0x15   : > { %357 = vmatmul.mubr.msk.bf16.vlgmr.msra.gmra.mrb[0].mxu0 %vm216_vm1, %v201_v4 }
  0x88   : > { %v208_v5 = vpop.permute.xlu0 %207 }
  0xe8   : > { %v254_v6 = vpop.f32.mrb[0].mxu0 }
  0xe9   : > { %v255_v7 = vadd.f32 %v254_v6, %v208_v5  ;;  %v358_v8 = vpop.f32.mrb[1].mxu0 }
  0xea   : > { %v257_v9 = vpop.f32.mrb[2].mxu0 }
  0xeb   : > { %261 = vst.msk [vmem:[%s199_s26] sm:$0xff] %vm260_vm2, %v255_v7  ;;  %v359_v10 = vpop.f32.mrb[3].mxu0 }
  0xec PF: > { %s13_s14 = sadd.s32 1, %s411_s14   ;;  %s479_s12 = smov %s407_s13 }
  0xed   : > { %p10_p5 = scmp.ge.s32.totalorder %s13_s14, 4   ;;  %s480_s13 = smov %s482_s15 }
  0xef   :  { %12 = sbr.rel (!%p10_p5) target bundleno = 2 (0x2), region = 62 }

// kernel: tpu_custom_call.1
= control target key start
LH: loop header
LB: loop body
LE: loop exit
PB: predicated region body
PF: predicated region fallthrough
CT: control target
= control target key end

     0   :  { %s436_s12 = smov 0   ;;  %s438_s13 = smov 0   ;;  %s475_s0 = inlined_call_operand.vmem [shape: bf16[2,16,4], index: 0, kind: input, shape index: {}]   ;;  %s476_s1 = inlined_call_operand.vmem [shape: bf16[8,16], index: 1, kind: input, shape index: {}]   ;;  %s477_s2 = inlined_call_operand.vmem [shape: f32[8,1], index: 2, kind: input, shape index: {}]   ;;  %s478_s3 = inlined_call_operand.vmem [shape: f32[2,8,4], index: 3, kind: output, shape index: {}]  }
   0x1   :  { %s440_s14 = smov 0  }
   0x2 LB: > { %s25_s15 = sadd.s32 1, %s407_s13  ;;  %p343_p0 = scmp.ge.s32.totalorder %s411_s14, 1  ;;  %s411_s14 = sphi %s440_s14, %s13_s14   ;;  %s407_s13 = sphi %s438_s13, %s480_s13   ;;  %s403_s12 = sphi %s436_s12, %s479_s12  }
   0x3   : > { %p27_p1 = scmp.ge.s32.totalorder %s25_s15, 2  ;;  %p156_p2 = scmp.lt.s32.totalorder %s411_s14, 3 }
   0x5   : > { %s482_s15 = smov (%p27_p1, %s25_s15), 0  ;;  %p157_p3 = pnand %p343_p0, %p156_p2 }
   0x6   : > { %p185_p4 = scmp.lt.s32.totalorder (!%p157_p3), %s403_s12, 1  ;;  %v413_v0 = vmov (!%p157_p3), 0.0   ;;  %vm414_vm0 = vmmov (!%p157_p3), 0   ;;  %v204_v1 = vld [vmem:[%s477_s2] sm:$0xff] (!%p157_p3)  ;;  %v415_v2 = vmov (!%p157_p3), 0   ;;  %vm216_vm1 = vcmask (!%p157_p3), 130048  }
   0x7   : > { %160 = sbr.rel (%p157_p3) target bundleno = 236 (0xec), region = 32  ;;  %354 = vmatprep.subr.bf16.mxu0 (!%p157_p3), %v413_v0  ;;  %356 = vmatprep.mubr.msk.bf16.mxu0 (!%p157_p3), %vm414_vm0, %v413_v0  ;;  %v201_v4 = vld [vmem:[%s476_s1] sm:$0xf] (!%p157_p3)  ;;  %vm260_vm2 = vcmask (!%p157_p3), 31744  }
   0x8   : > { %387 = vset.pattern.permute.xlu0 (!%p157_p3), %v415_v2 }
   0x9   : > { %207 = vperm.xlu0 (!%p157_p3), %387, %v204_v1  }
   0xe   : > { %s484_s12 = smov (!%p185_p4, %s403_s12), 1 }
   0xf   : > { %s351_s18 = sshll.u32 %s484_s12, 3 }
  0x10   : > { %s192_s21 = scalar_lea.vmem %s475_s0, %s351_s18  ;;  %s199_s26 = scalar_lea.vmem %s478_s3, %s351_s18 }
  0x11   : > { %v388_v3 = vld [vmem:[%s192_s21] sm:$0xff]  }
  0x12   : > { %355 = vmatpush3.bf16.msra.mxu0 %v388_v3 }
  0x15   : > { %357 = vmatmul.mubr.msk.bf16.vlgmr.msra.gmra.mrb[0].mxu0 %vm216_vm1, %v201_v4 }
  0x88   : > { %v208_v5 = vpop.permute.xlu0 %207 }
  0xe8   : > { %v254_v6 = vpop.f32.mrb[0].mxu0 }
  0xe9   : > { %v255_v7 = vadd.f32 %v254_v6, %v208_v5  ;;  %v358_v8 = vpop.f32.mrb[1].mxu0 }
  0xea   : > { %v257_v9 = vpop.f32.mrb[2].mxu0 }
  0xeb   : > { %261 = vst.msk [vmem:[%s199_s26] sm:$0xff] %vm260_vm2, %v255_v7  ;;  %v359_v10 = vpop.f32.mrb[3].mxu0 }
  0xec PF: > { %s13_s14 = sadd.s32 1, %s411_s14   ;;  %s479_s12 = smov %s407_s13 }
  0xed   : > { %p10_p5 = scmp.ge.s32.totalorder %s13_s14, 4   ;;  %s480_s13 = smov %s482_s15 }
  0xef   :  { %12 = sbr.rel (!%p10_p5) target bundleno = 2 (0x2), region = 62 }

</bundles_post_ra>
